<compile_context>
chip_gen: v7x
topology: tpu7x:2x2x1
jax: 0.10.0
libtpu: 0.0.40
codegen_flags: <defaults>
</compile_context>

<pallas_src>
import jax
import jax.numpy as jnp
import numpy as np
from jax import lax
from jax.experimental import pallas as pl
from jax.experimental.pallas import tpu as pltpu

LN_EPS = 1e-5  # PyTorch nn.LayerNorm default


def _layer_norm_f32(x, gamma, beta):
    mu = jnp.mean(x, axis=-1, keepdims=True)
    xc = x - mu
    var = jnp.mean(xc * xc, axis=-1, keepdims=True)
    return xc * lax.rsqrt(var + jnp.float32(LN_EPS)) * gamma + beta


def _pick_bt(B, S, row_target=256):
    """Smallest divisor of B whose token count Bt*S reaches the MXU row target
    (256 for v6e/v7x; 128 would be enough on v5e); falls back to the whole batch."""
    for bt in range(1, B + 1):
        if B % bt == 0 and bt * S >= row_target:
            return bt
    return B


def _make_kernel(Bt, S, D, FF, nhead):
    head_dim = D // nhead
    T = Bt * S  # tokens per grid step

    def kernel(src_ref, wq_ref, bq_ref, wk_ref, bk_ref, wv_ref, bv_ref,
               wo_ref, bo_ref, w1_ref, b1_ref, w2_ref, b2_ref,
               g1_ref, be1_ref, g2_ref, be2_ref,
               out_ref, xn_scr, acc_scr):
        h = pl.program_id(1)

        # ---- once per batch tile: pre-norm 1 into scratch, zero the attention accumulator ----
        @pl.when(h == 0)
        def _init():
            x = src_ref[...].reshape(T, D)                       # [T, D] f32 (reshape keeps lane dim)
            xn = _layer_norm_f32(x, g1_ref[...], be1_ref[...])
            xn_scr[...] = xn.astype(jnp.bfloat16)
            acc_scr[...] = jnp.zeros_like(acc_scr)

        # ---- per-head attention; head-h weights streamed in by BlockSpec (no lane slicing) ----
        xn = xn_scr[...]                                         # bf16 [T, D]
        q = jnp.dot(xn, wq_ref[0], preferred_element_type=jnp.float32) + bq_ref[0]   # [T, hd]
        k = jnp.dot(xn, wk_ref[0], preferred_element_type=jnp.float32) + bk_ref[0]
        v = jnp.dot(xn, wv_ref[0], preferred_element_type=jnp.float32) + bv_ref[0]

        qb = q.reshape(Bt, S, head_dim).astype(jnp.bfloat16)     # split token dim only
        kb = k.reshape(Bt, S, head_dim).astype(jnp.bfloat16)
        vb = v.reshape(Bt, S, head_dim).astype(jnp.bfloat16)

        s = jnp.einsum('bqd,bkd->bqk', qb, kb,
                       preferred_element_type=jnp.float32)       # [Bt, S, S]
        s = s - jnp.max(s, axis=-1, keepdims=True)
        p = jnp.exp(s)
        p = p * pl.reciprocal(jnp.sum(p, axis=-1, keepdims=True), approx=True)
        o = jnp.einsum('bqk,bkd->bqd', p.astype(jnp.bfloat16), vb,
                       preferred_element_type=jnp.float32)       # [Bt, S, hd]

        # accumulate this head's contribution through its slice of the output projection
        acc_scr[...] += jnp.dot(o.reshape(T, head_dim).astype(jnp.bfloat16), wo_ref[0],
                                preferred_element_type=jnp.float32)              # [T, D]

        # ---- once per batch tile (last head): residual, pre-norm 2, FFN, residual, store ----
        @pl.when(h == nhead - 1)
        def _finalize():
            x = src_ref[...].reshape(T, D)
            x1 = x + acc_scr[...] + bo_ref[...]                  # attention residual (+ out_proj bias)
            xn2 = _layer_norm_f32(x1, g2_ref[...], be2_ref[...]).astype(jnp.bfloat16)
            hmid = jnp.dot(xn2, w1_ref[...], preferred_element_type=jnp.float32) + b1_ref[...]
            hmid = jnp.maximum(hmid, 0.0).astype(jnp.bfloat16)   # relu
            y = jnp.dot(hmid, w2_ref[...], preferred_element_type=jnp.float32) + b2_ref[...]
            out_ref[...] = (x1 + y).reshape(Bt, S, D)

    return kernel


def transformer_encoder_layer(src, params, nhead, row_target=256):
    """src: [S, B, D] float32 (PyTorch layout) -> [S, B, D] float32."""
    S, B, D = src.shape
    FF = params["w1"].shape[0]
    assert D % nhead == 0
    hd = D // nhead
    scale = float(hd) ** -0.5

    Bt = _pick_bt(B, S, row_target)
    T = Bt * S

    f32, bf16 = jnp.float32, jnp.bfloat16

    # batch-major for per-tile grid blocks
    src_bm = jnp.transpose(src, (1, 0, 2)).astype(f32)           # [B, S, D]

    # ---- host-side weight layout (one-time, free plumbing) ----
    w_in = params["w_in"].astype(f32)                            # [3D, D]  rows = [Wq; Wk; Wv]
    b_in = params["b_in"].astype(f32)
    wq, wk, wv = w_in[:D], w_in[D:2 * D], w_in[2 * D:]
    bq, bk, bv = b_in[:D], b_in[D:2 * D], b_in[2 * D:]

    # per-head stacks, pre-transposed so every kernel matmul is x @ W;
    # the 1/sqrt(hd) query scaling is folded into Wq / bq here.
    to_heads_w = lambda w: jnp.transpose(w.T.reshape(D, nhead, hd), (1, 0, 2))   # [H, D, hd]
    wq_h = to_heads_w(wq * scale).astype(bf16)
    wk_h = to_heads_w(wk).astype(bf16)
    wv_h = to_heads_w(wv).astype(bf16)
    bq_h = (bq * scale).reshape(nhead, 1, hd).astype(f32)
    bk_h = bk.reshape(nhead, 1, hd).astype(f32)
    bv_h = bv.reshape(nhead, 1, hd).astype(f32)

    wo_h = params["w_out"].astype(f32).T.reshape(nhead, hd, D).astype(bf16)      # [H, hd, D]
    bo = params["b_out"].reshape(1, D).astype(f32)

    w1_t = params["w1"].astype(f32).T.astype(bf16)               # [D, FF]
    b1 = params["b1"].reshape(1, FF).astype(f32)
    w2_t = params["w2"].astype(f32).T.astype(bf16)               # [FF, D]
    b2 = params["b2"].reshape(1, D).astype(f32)
    g1 = params["g1"].reshape(1, D).astype(f32)
    be1 = params["be1"].reshape(1, D).astype(f32)
    g2 = params["g2"].reshape(1, D).astype(f32)
    be2 = params["be2"].reshape(1, D).astype(f32)

    kernel = _make_kernel(Bt, S, D, FF, nhead)

    const = lambda shape: pl.BlockSpec(shape, lambda i, h: (0,) * len(shape))      # resident
    per_head = lambda shape: pl.BlockSpec((1,) + shape, lambda i, h: (h, 0, 0))    # streamed per head

    out_bm = pl.pallas_call(
        kernel,
        out_shape=jax.ShapeDtypeStruct((B, S, D), jnp.float32),
        grid=(B // Bt, nhead),
        in_specs=[
            pl.BlockSpec((Bt, S, D), lambda i, h: (i, 0, 0)),    # src (one batch tile)
            per_head((D, hd)), per_head((1, hd)),                # Wq, bq   (scale folded in)
            per_head((D, hd)), per_head((1, hd)),                # Wk, bk
            per_head((D, hd)), per_head((1, hd)),                # Wv, bv
            per_head((hd, D)), const((1, D)),                    # Wout rows per head, b_out
            const((D, FF)), const((1, FF)),                      # linear1
            const((FF, D)), const((1, D)),                       # linear2
            const((1, D)), const((1, D)),                        # norm1 gamma/beta
            const((1, D)), const((1, D)),                        # norm2 gamma/beta
        ],
        out_specs=pl.BlockSpec((Bt, S, D), lambda i, h: (i, 0, 0)),
        scratch_shapes=[pltpu.VMEM((T, D), jnp.bfloat16),        # post-LN1 activations
                        pltpu.VMEM((T, D), jnp.float32)],        # attention accumulator
        compiler_params=pltpu.CompilerParams(
            dimension_semantics=("parallel", "arbitrary")),
    )(src_bm, wq_h, bq_h, wk_h, bk_h, wv_h, bv_h, wo_h, bo,
      w1_t, b1, w2_t, b2, g1, be1, g2, be2)

    return jnp.transpose(out_bm, (1, 0, 2))                      # back to [S, B, D]


def _reference(src, params, nhead):
    """Pure-JAX f32 reference mirroring the PyTorch module (eval mode, pre-norm)."""
    S, B, D = src.shape
    hd = D // nhead

    def ln(x, g, b):
        mu = x.mean(-1, keepdims=True)
        var = ((x - mu) ** 2).mean(-1, keepdims=True)
        return (x - mu) / jnp.sqrt(var + LN_EPS) * g + b

    xn = ln(src, params["g1"], params["be1"])
    qkv = xn @ params["w_in"].T + params["b_in"]                 # [S, B, 3D]
    q, k, v = jnp.split(qkv, 3, axis=-1)
    q = q * (hd ** -0.5)
    to_heads = lambda t: t.reshape(S, B * nhead, hd).transpose(1, 0, 2)
    qh, kh, vh = to_heads(q), to_heads(k), to_heads(v)
    p = jax.nn.softmax(qh @ kh.transpose(0, 2, 1), axis=-1)      # [B*H, S, S]
    o = (p @ vh).transpose(1, 0, 2).reshape(S, B, D)
    attn = o @ params["w_out"].T + params["b_out"]
    x1 = src + attn
    xn2 = ln(x1, params["g2"], params["be2"])
    h = jax.nn.relu(xn2 @ params["w1"].T + params["b1"])
    y = h @ params["w2"].T + params["b2"]
    return x1 + y


if __name__ == "__main__":
    S, B, D = 8, 2, 32
    nhead = 4
    FF = 64

    key = jax.random.PRNGKey(0)
    ks = jax.random.split(key, 16)
    normal = lambda k, shape, s=0.1: (s * jax.random.normal(k, shape)).astype(jnp.float32)

    params = {
        "w_in": normal(ks[0], (3 * D, D)),
        "b_in": normal(ks[1], (3 * D,)),
        "w_out": normal(ks[2], (D, D)),
        "b_out": normal(ks[3], (D,)),
        "w1": normal(ks[4], (FF, D)),
        "b1": normal(ks[5], (FF,)),
        "w2": normal(ks[6], (D, FF)),
        "b2": normal(ks[7], (D,)),
        "g1": (1.0 + normal(ks[8], (D,))).astype(jnp.float32),
        "be1": normal(ks[9], (D,)),
        "g2": (1.0 + normal(ks[10], (D,))).astype(jnp.float32),
        "be2": normal(ks[11], (D,)),
    }
    src = normal(ks[12], (S, B, D), s=1.0)

    out = transformer_encoder_layer(src, params, nhead)
    out = jax.block_until_ready(out)

    ref = _reference(src, params, nhead)
    # bf16 matmul operands + approx softmax reciprocal -> loosened tolerance vs f32 reference.
    np.testing.assert_allclose(np.asarray(out), np.asarray(ref), rtol=2e-2, atol=2e-2)

    print("KERNEL_OK")
</pallas_src>

<mosaic_0001>
module attributes {stable_mosaic.version = 11 : i64} {
  func.func @kernel(%arg0: i32, %arg1: i32, %arg2: memref<2x8x32xf32, #tpu.memory_space<vmem>>, %arg3: memref<1x32x8xbf16, #tpu.memory_space<vmem>>, %arg4: memref<1x1x8xf32, #tpu.memory_space<vmem>>, %arg5: memref<1x32x8xbf16, #tpu.memory_space<vmem>>, %arg6: memref<1x1x8xf32, #tpu.memory_space<vmem>>, %arg7: memref<1x32x8xbf16, #tpu.memory_space<vmem>>, %arg8: memref<1x1x8xf32, #tpu.memory_space<vmem>>, %arg9: memref<1x8x32xbf16, #tpu.memory_space<vmem>>, %arg10: memref<1x32xf32, #tpu.memory_space<vmem>>, %arg11: memref<32x64xbf16, #tpu.memory_space<vmem>>, %arg12: memref<1x64xf32, #tpu.memory_space<vmem>>, %arg13: memref<64x32xbf16, #tpu.memory_space<vmem>>, %arg14: memref<1x32xf32, #tpu.memory_space<vmem>>, %arg15: memref<1x32xf32, #tpu.memory_space<vmem>>, %arg16: memref<1x32xf32, #tpu.memory_space<vmem>>, %arg17: memref<1x32xf32, #tpu.memory_space<vmem>>, %arg18: memref<1x32xf32, #tpu.memory_space<vmem>>, %arg19: memref<2x8x32xf32, #tpu.memory_space<vmem>>, %arg20: memref<16x32xbf16, #tpu.memory_space<vmem>>, %arg21: memref<16x32xf32, #tpu.memory_space<vmem>>) attributes {dimension_semantics = [#tpu.dimension_semantics<parallel>, #tpu.dimension_semantics<arbitrary>], iteration_bounds = array<i64: 1, 4>, scalar_prefetch = 0 : i64, scratch_operands = 2 : i64, tpu.core_type = #tpu.core_type<tc>, window_params = [{transform_indices = @transform_0, window_bounds = array<i64: 2, 8, 32>}, {transform_indices = @transform_1, window_bounds = array<i64: 1, 32, 8>}, {transform_indices = @transform_2, window_bounds = array<i64: 1, 1, 8>}, {transform_indices = @transform_3, window_bounds = array<i64: 1, 32, 8>}, {transform_indices = @transform_4, window_bounds = array<i64: 1, 1, 8>}, {transform_indices = @transform_5, window_bounds = array<i64: 1, 32, 8>}, {transform_indices = @transform_6, window_bounds = array<i64: 1, 1, 8>}, {transform_indices = @transform_7, window_bounds = array<i64: 1, 8, 32>}, {pipeline_mode = #tpu.pipeline_mode<synchronous>, transform_indices = @transform_8, window_bounds = array<i64: 1, 32>}, {pipeline_mode = #tpu.pipeline_mode<synchronous>, transform_indices = @transform_9, window_bounds = array<i64: 32, 64>}, {pipeline_mode = #tpu.pipeline_mode<synchronous>, transform_indices = @transform_10, window_bounds = array<i64: 1, 64>}, {pipeline_mode = #tpu.pipeline_mode<synchronous>, transform_indices = @transform_11, window_bounds = array<i64: 64, 32>}, {pipeline_mode = #tpu.pipeline_mode<synchronous>, transform_indices = @transform_12, window_bounds = array<i64: 1, 32>}, {pipeline_mode = #tpu.pipeline_mode<synchronous>, transform_indices = @transform_13, window_bounds = array<i64: 1, 32>}, {pipeline_mode = #tpu.pipeline_mode<synchronous>, transform_indices = @transform_14, window_bounds = array<i64: 1, 32>}, {pipeline_mode = #tpu.pipeline_mode<synchronous>, transform_indices = @transform_15, window_bounds = array<i64: 1, 32>}, {pipeline_mode = #tpu.pipeline_mode<synchronous>, transform_indices = @transform_16, window_bounds = array<i64: 1, 32>}, {transform_indices = @transform_17, window_bounds = array<i64: 2, 8, 32>}]} {
    %c0_i32 = arith.constant 0 : i32
    %0 = arith.cmpi eq, %arg1, %c0_i32 : i32
    %1 = arith.extui %0 : i1 to i32
    %c0_i32_0 = arith.constant 0 : i32
    %2 = arith.cmpi ne, %1, %c0_i32_0 : i32
    scf.if %2 {
      %c0_35 = arith.constant 0 : index
      %c0_36 = arith.constant 0 : index
      %c0_37 = arith.constant 0 : index
      %55 = vector.load %arg2[%c0_35, %c0_36, %c0_37] : memref<2x8x32xf32, #tpu.memory_space<vmem>>, vector<2x8x32xf32>
      %56 = vector.shape_cast %55 : vector<2x8x32xf32> to vector<16x32xf32>
      %c0_38 = arith.constant 0 : index
      %c0_39 = arith.constant 0 : index
      %57 = vector.load %arg15[%c0_38, %c0_39] : memref<1x32xf32, #tpu.memory_space<vmem>>, vector<1x32xf32>
      %c0_40 = arith.constant 0 : index
      %c0_41 = arith.constant 0 : index
      %58 = vector.load %arg16[%c0_40, %c0_41] : memref<1x32xf32, #tpu.memory_space<vmem>>, vector<1x32xf32>
      %cst_42 = arith.constant dense<0.000000e+00> : vector<16xf32>
      %59 = vector.multi_reduction <add>, %56, %cst_42 [1] : vector<16x32xf32> to vector<16xf32>
      %60 = vector.shape_cast %59 : vector<16xf32> to vector<16x1xf32>
      %cst_43 = arith.constant 3.200000e+01 : f32
      %61 = vector.broadcast %cst_43 : f32 to vector<16x1xf32>
      %62 = arith.divf %60, %61 : vector<16x1xf32>
      %63 = vector.broadcast %62 : vector<16x1xf32> to vector<16x32xf32>
      %64 = arith.subf %56, %63 : vector<16x32xf32>
      %65 = arith.mulf %64, %64 : vector<16x32xf32>
      %cst_44 = arith.constant dense<0.000000e+00> : vector<16xf32>
      %66 = vector.multi_reduction <add>, %65, %cst_44 [1] : vector<16x32xf32> to vector<16xf32>
      %67 = vector.shape_cast %66 : vector<16xf32> to vector<16x1xf32>
      %cst_45 = arith.constant 3.200000e+01 : f32
      %68 = vector.broadcast %cst_45 : f32 to vector<16x1xf32>
      %69 = arith.divf %67, %68 : vector<16x1xf32>
      %cst_46 = arith.constant 9.99999974E-6 : f32
      %70 = vector.broadcast %cst_46 : f32 to vector<16x1xf32>
      %71 = arith.addf %69, %70 : vector<16x1xf32>
      %72 = math.rsqrt %71 : vector<16x1xf32>
      %73 = vector.broadcast %72 : vector<16x1xf32> to vector<16x32xf32>
      %74 = arith.mulf %64, %73 : vector<16x32xf32>
      %75 = vector.broadcast %57 : vector<1x32xf32> to vector<16x32xf32>
      %76 = arith.mulf %74, %75 : vector<16x32xf32>
      %77 = vector.broadcast %58 : vector<1x32xf32> to vector<16x32xf32>
      %78 = arith.addf %76, %77 : vector<16x32xf32>
      %79 = arith.truncf %78 : vector<16x32xf32> to vector<16x32xbf16>
      %c0_47 = arith.constant 0 : index
      %c0_48 = arith.constant 0 : index
      %80 = vector.load %arg20[%c0_47, %c0_48] : memref<16x32xbf16, #tpu.memory_space<vmem>>, vector<16x32xbf16>
      tpu.vector_store %arg20[%c0_47, %c0_48], %79 {strides = array<i32>} : memref<16x32xbf16, #tpu.memory_space<vmem>>, vector<16x32xbf16>,
      %cst_49 = arith.constant 0.000000e+00 : f32
      %81 = vector.broadcast %cst_49 : f32 to vector<16x32xf32>
      %c0_50 = arith.constant 0 : index
      %c0_51 = arith.constant 0 : index
      %82 = vector.load %arg21[%c0_50, %c0_51] : memref<16x32xf32, #tpu.memory_space<vmem>>, vector<16x32xf32>
      tpu.vector_store %arg21[%c0_50, %c0_51], %81 {strides = array<i32>} : memref<16x32xf32, #tpu.memory_space<vmem>>, vector<16x32xf32>,
    } else {
    }
    %c0 = arith.constant 0 : index
    %c0_1 = arith.constant 0 : index
    %3 = vector.load %arg20[%c0, %c0_1] : memref<16x32xbf16, #tpu.memory_space<vmem>>, vector<16x32xbf16>
    %c0_2 = arith.constant 0 : index
    %c0_3 = arith.constant 0 : index
    %c0_4 = arith.constant 0 : index
    %4 = vector.load %arg3[%c0_2, %c0_3, %c0_4] : memref<1x32x8xbf16, #tpu.memory_space<vmem>>, vector<1x32x8xbf16>
    %5 = vector.shape_cast %4 : vector<1x32x8xbf16> to vector<32x8xbf16>
    %cst = arith.constant dense<0.000000e+00> : vector<16x8xf32>
    %6 = tpu.matmul %3, %5, %cst {dimension_numbers = #tpu.dot_dimension_numbers<[1], [0], [0], [1], [0, 0, 1, 1], [], []>} : vector<16x32xbf16>, vector<32x8xbf16>, vector<16x8xf32> -> vector<16x8xf32>
    %c0_5 = arith.constant 0 : index
    %c0_6 = arith.constant 0 : index
    %c0_7 = arith.constant 0 : index
    %7 = vector.load %arg4[%c0_5, %c0_6, %c0_7] : memref<1x1x8xf32, #tpu.memory_space<vmem>>, vector<1x1x8xf32>
    %8 = vector.shape_cast %7 : vector<1x1x8xf32> to vector<1x8xf32>
    %9 = vector.broadcast %8 : vector<1x8xf32> to vector<16x8xf32>
    %10 = arith.addf %6, %9 : vector<16x8xf32>
    %c0_8 = arith.constant 0 : index
    %c0_9 = arith.constant 0 : index
    %c0_10 = arith.constant 0 : index
    %11 = vector.load %arg5[%c0_8, %c0_9, %c0_10] : memref<1x32x8xbf16, #tpu.memory_space<vmem>>, vector<1x32x8xbf16>
    %12 = vector.shape_cast %11 : vector<1x32x8xbf16> to vector<32x8xbf16>
    %cst_11 = arith.constant dense<0.000000e+00> : vector<16x8xf32>
    %13 = tpu.matmul %3, %12, %cst_11 {dimension_numbers = #tpu.dot_dimension_numbers<[1], [0], [0], [1], [0, 0, 1, 1], [], []>} : vector<16x32xbf16>, vector<32x8xbf16>, vector<16x8xf32> -> vector<16x8xf32>
    %c0_12 = arith.constant 0 : index
    %c0_13 = arith.constant 0 : index
    %c0_14 = arith.constant 0 : index
    %14 = vector.load %arg6[%c0_12, %c0_13, %c0_14] : memref<1x1x8xf32, #tpu.memory_space<vmem>>, vector<1x1x8xf32>
    %15 = vector.shape_cast %14 : vector<1x1x8xf32> to vector<1x8xf32>
    %16 = vector.broadcast %15 : vector<1x8xf32> to vector<16x8xf32>
    %17 = arith.addf %13, %16 : vector<16x8xf32>
    %c0_15 = arith.constant 0 : index
    %c0_16 = arith.constant 0 : index
    %c0_17 = arith.constant 0 : index
    %18 = vector.load %arg7[%c0_15, %c0_16, %c0_17] : memref<1x32x8xbf16, #tpu.memory_space<vmem>>, vector<1x32x8xbf16>
    %19 = vector.shape_cast %18 : vector<1x32x8xbf16> to vector<32x8xbf16>
    %cst_18 = arith.constant dense<0.000000e+00> : vector<16x8xf32>
    %20 = tpu.matmul %3, %19, %cst_18 {dimension_numbers = #tpu.dot_dimension_numbers<[1], [0], [0], [1], [0, 0, 1, 1], [], []>} : vector<16x32xbf16>, vector<32x8xbf16>, vector<16x8xf32> -> vector<16x8xf32>
    %c0_19 = arith.constant 0 : index
    %c0_20 = arith.constant 0 : index
    %c0_21 = arith.constant 0 : index
    %21 = vector.load %arg8[%c0_19, %c0_20, %c0_21] : memref<1x1x8xf32, #tpu.memory_space<vmem>>, vector<1x1x8xf32>
    %22 = vector.shape_cast %21 : vector<1x1x8xf32> to vector<1x8xf32>
    %23 = vector.broadcast %22 : vector<1x8xf32> to vector<16x8xf32>
    %24 = arith.addf %20, %23 : vector<16x8xf32>
    %25 = vector.shape_cast %10 : vector<16x8xf32> to vector<2x8x8xf32>
    %26 = arith.truncf %25 : vector<2x8x8xf32> to vector<2x8x8xbf16>
    %27 = vector.shape_cast %17 : vector<16x8xf32> to vector<2x8x8xf32>
    %28 = arith.truncf %27 : vector<2x8x8xf32> to vector<2x8x8xbf16>
    %29 = vector.shape_cast %24 : vector<16x8xf32> to vector<2x8x8xf32>
    %30 = arith.truncf %29 : vector<2x8x8xf32> to vector<2x8x8xbf16>
    "tpu.trace_start"() <{level = 10 : i32, message = "bqd,bkd->bqk"}> : () -> ()
    %cst_22 = arith.constant dense<0.000000e+00> : vector<2x8x8xf32>
    %31 = tpu.matmul %26, %28, %cst_22 {dimension_numbers = #tpu.dot_dimension_numbers<[2], [2], [1], [1], [0, 0, 0, 1, 1, 1], [0], [0]>} : vector<2x8x8xbf16>, vector<2x8x8xbf16>, vector<2x8x8xf32> -> vector<2x8x8xf32>
    "tpu.trace_stop"() : () -> ()
    %cst_23 = arith.constant dense<0xFF800000> : vector<2x8xf32>
    %32 = vector.multi_reduction <maximumf>, %31, %cst_23 [2] : vector<2x8x8xf32> to vector<2x8xf32>
    %33 = vector.shape_cast %32 : vector<2x8xf32> to vector<2x8x1xf32>
    %34 = vector.broadcast %33 : vector<2x8x1xf32> to vector<2x8x8xf32>
    %35 = arith.subf %31, %34 : vector<2x8x8xf32>
    %36 = math.exp %35 : vector<2x8x8xf32>
    %cst_24 = arith.constant dense<0.000000e+00> : vector<2x8xf32>
    %37 = vector.multi_reduction <add>, %36, %cst_24 [2] : vector<2x8x8xf32> to vector<2x8xf32>
    %38 = vector.shape_cast %37 : vector<2x8xf32> to vector<2x8x1xf32>
    %39 = tpu.reciprocal %38 {approx = true} : vector<2x8x1xf32> -> vector<2x8x1xf32>
    %40 = vector.broadcast %39 : vector<2x8x1xf32> to vector<2x8x8xf32>
    %41 = arith.mulf %36, %40 : vector<2x8x8xf32>
    %42 = arith.truncf %41 : vector<2x8x8xf32> to vector<2x8x8xbf16>
    "tpu.trace_start"() <{level = 10 : i32, message = "bqk,bkd->bqd"}> : () -> ()
    %cst_25 = arith.constant dense<0.000000e+00> : vector<2x8x8xf32>
    %43 = tpu.matmul %42, %30, %cst_25 {dimension_numbers = #tpu.dot_dimension_numbers<[2], [1], [1], [2], [0, 0, 0, 1, 1, 2], [0], [0]>} : vector<2x8x8xbf16>, vector<2x8x8xbf16>, vector<2x8x8xf32> -> vector<2x8x8xf32>
    "tpu.trace_stop"() : () -> ()
    %c0_26 = arith.constant 0 : index
    %c0_27 = arith.constant 0 : index
    %44 = vector.load %arg21[%c0_26, %c0_27] : memref<16x32xf32, #tpu.memory_space<vmem>>, vector<16x32xf32>
    %45 = vector.shape_cast %43 : vector<2x8x8xf32> to vector<16x8xf32>
    %46 = arith.truncf %45 : vector<16x8xf32> to vector<16x8xbf16>
    %c0_28 = arith.constant 0 : index
    %c0_29 = arith.constant 0 : index
    %c0_30 = arith.constant 0 : index
    %47 = vector.load %arg9[%c0_28, %c0_29, %c0_30] : memref<1x8x32xbf16, #tpu.memory_space<vmem>>, vector<1x8x32xbf16>
    %48 = vector.shape_cast %47 : vector<1x8x32xbf16> to vector<8x32xbf16>
    %cst_31 = arith.constant dense<0.000000e+00> : vector<16x32xf32>
    %49 = tpu.matmul %46, %48, %cst_31 {dimension_numbers = #tpu.dot_dimension_numbers<[1], [0], [0], [1], [0, 0, 1, 1], [], []>} : vector<16x8xbf16>, vector<8x32xbf16>, vector<16x32xf32> -> vector<16x32xf32>
    %50 = arith.addf %44, %49 : vector<16x32xf32>
    %c0_32 = arith.constant 0 : index
    %c0_33 = arith.constant 0 : index
    %51 = vector.load %arg21[%c0_32, %c0_33] : memref<16x32xf32, #tpu.memory_space<vmem>>, vector<16x32xf32>
    tpu.vector_store %arg21[%c0_32, %c0_33], %50 {strides = array<i32>} : memref<16x32xf32, #tpu.memory_space<vmem>>, vector<16x32xf32>,
    %c3_i32 = arith.constant 3 : i32
    %52 = arith.cmpi eq, %arg1, %c3_i32 : i32
    %53 = arith.extui %52 : i1 to i32
    %c0_i32_34 = arith.constant 0 : i32
    %54 = arith.cmpi ne, %53, %c0_i32_34 : i32
    scf.if %54 {
      %c0_35 = arith.constant 0 : index
      %c0_36 = arith.constant 0 : index
      %c0_37 = arith.constant 0 : index
      %55 = vector.load %arg2[%c0_35, %c0_36, %c0_37] : memref<2x8x32xf32, #tpu.memory_space<vmem>>, vector<2x8x32xf32>
      %56 = vector.shape_cast %55 : vector<2x8x32xf32> to vector<16x32xf32>
      %c0_38 = arith.constant 0 : index
      %c0_39 = arith.constant 0 : index
      %57 = vector.load %arg21[%c0_38, %c0_39] : memref<16x32xf32, #tpu.memory_space<vmem>>, vector<16x32xf32>
      %58 = arith.addf %56, %57 : vector<16x32xf32>
      %c0_40 = arith.constant 0 : index
      %c0_41 = arith.constant 0 : index
      %59 = vector.load %arg10[%c0_40, %c0_41] : memref<1x32xf32, #tpu.memory_space<vmem>>, vector<1x32xf32>
      %60 = vector.broadcast %59 : vector<1x32xf32> to vector<16x32xf32>
      %61 = arith.addf %58, %60 : vector<16x32xf32>
      %c0_42 = arith.constant 0 : index
      %c0_43 = arith.constant 0 : index
      %62 = vector.load %arg17[%c0_42, %c0_43] : memref<1x32xf32, #tpu.memory_space<vmem>>, vector<1x32xf32>
      %c0_44 = arith.constant 0 : index
      %c0_45 = arith.constant 0 : index
      %63 = vector.load %arg18[%c0_44, %c0_45] : memref<1x32xf32, #tpu.memory_space<vmem>>, vector<1x32xf32>
      %cst_46 = arith.constant dense<0.000000e+00> : vector<16xf32>
      %64 = vector.multi_reduction <add>, %61, %cst_46 [1] : vector<16x32xf32> to vector<16xf32>
      %65 = vector.shape_cast %64 : vector<16xf32> to vector<16x1xf32>
      %cst_47 = arith.constant 3.200000e+01 : f32
      %66 = vector.broadcast %cst_47 : f32 to vector<16x1xf32>
      %67 = arith.divf %65, %66 : vector<16x1xf32>
      %68 = vector.broadcast %67 : vector<16x1xf32> to vector<16x32xf32>
      %69 = arith.subf %61, %68 : vector<16x32xf32>
      %70 = arith.mulf %69, %69 : vector<16x32xf32>
      %cst_48 = arith.constant dense<0.000000e+00> : vector<16xf32>
      %71 = vector.multi_reduction <add>, %70, %cst_48 [1] : vector<16x32xf32> to vector<16xf32>
      %72 = vector.shape_cast %71 : vector<16xf32> to vector<16x1xf32>
      %cst_49 = arith.constant 3.200000e+01 : f32
      %73 = vector.broadcast %cst_49 : f32 to vector<16x1xf32>
      %74 = arith.divf %72, %73 : vector<16x1xf32>
      %cst_50 = arith.constant 9.99999974E-6 : f32
      %75 = vector.broadcast %cst_50 : f32 to vector<16x1xf32>
      %76 = arith.addf %74, %75 : vector<16x1xf32>
      %77 = math.rsqrt %76 : vector<16x1xf32>
      %78 = vector.broadcast %77 : vector<16x1xf32> to vector<16x32xf32>
      %79 = arith.mulf %69, %78 : vector<16x32xf32>
      %80 = vector.broadcast %62 : vector<1x32xf32> to vector<16x32xf32>
      %81 = arith.mulf %79, %80 : vector<16x32xf32>
      %82 = vector.broadcast %63 : vector<1x32xf32> to vector<16x32xf32>
      %83 = arith.addf %81, %82 : vector<16x32xf32>
      %84 = arith.truncf %83 : vector<16x32xf32> to vector<16x32xbf16>
      %c0_51 = arith.constant 0 : index
      %c0_52 = arith.constant 0 : index
      %85 = vector.load %arg11[%c0_51, %c0_52] : memref<32x64xbf16, #tpu.memory_space<vmem>>, vector<32x64xbf16>
      %cst_53 = arith.constant dense<0.000000e+00> : vector<16x64xf32>
      %86 = tpu.matmul %84, %85, %cst_53 {dimension_numbers = #tpu.dot_dimension_numbers<[1], [0], [0], [1], [0, 0, 1, 1], [], []>} : vector<16x32xbf16>, vector<32x64xbf16>, vector<16x64xf32> -> vector<16x64xf32>
      %c0_54 = arith.constant 0 : index
      %c0_55 = arith.constant 0 : index
      %87 = vector.load %arg12[%c0_54, %c0_55] : memref<1x64xf32, #tpu.memory_space<vmem>>, vector<1x64xf32>
      %88 = vector.broadcast %87 : vector<1x64xf32> to vector<16x64xf32>
      %89 = arith.addf %86, %88 : vector<16x64xf32>
      %cst_56 = arith.constant 0.000000e+00 : f32
      %90 = vector.broadcast %cst_56 : f32 to vector<16x64xf32>
      %91 = arith.maximumf %89, %90 : vector<16x64xf32>
      %92 = arith.truncf %91 : vector<16x64xf32> to vector<16x64xbf16>
      %c0_57 = arith.constant 0 : index
      %c0_58 = arith.constant 0 : index
      %93 = vector.load %arg13[%c0_57, %c0_58] : memref<64x32xbf16, #tpu.memory_space<vmem>>, vector<64x32xbf16>
      %cst_59 = arith.constant dense<0.000000e+00> : vector<16x32xf32>
      %94 = tpu.matmul %92, %93, %cst_59 {dimension_numbers = #tpu.dot_dimension_numbers<[1], [0], [0], [1], [0, 0, 1, 1], [], []>} : vector<16x64xbf16>, vector<64x32xbf16>, vector<16x32xf32> -> vector<16x32xf32>
      %c0_60 = arith.constant 0 : index
      %c0_61 = arith.constant 0 : index
      %95 = vector.load %arg14[%c0_60, %c0_61] : memref<1x32xf32, #tpu.memory_space<vmem>>, vector<1x32xf32>
      %96 = vector.broadcast %95 : vector<1x32xf32> to vector<16x32xf32>
      %97 = arith.addf %94, %96 : vector<16x32xf32>
      %98 = arith.addf %61, %97 : vector<16x32xf32>
      %99 = vector.shape_cast %98 : vector<16x32xf32> to vector<2x8x32xf32>
      %c0_62 = arith.constant 0 : index
      %c0_63 = arith.constant 0 : index
      %c0_64 = arith.constant 0 : index
      %100 = vector.load %arg19[%c0_62, %c0_63, %c0_64] : memref<2x8x32xf32, #tpu.memory_space<vmem>>, vector<2x8x32xf32>
      tpu.vector_store %arg19[%c0_62, %c0_63, %c0_64], %99 {strides = array<i32>} : memref<2x8x32xf32, #tpu.memory_space<vmem>>, vector<2x8x32xf32>,
    } else {
    }
    return
  }
  func.func @transform_0(%arg0: i32, %arg1: i32) -> (i32, i32, i32) {
    %c0_i32 = arith.constant 0 : i32
    %c0_i32_0 = arith.constant 0 : i32
    %c0_i32_1 = arith.constant 0 : i32
    return %arg0, %c0_i32, %c0_i32_0 : i32, i32, i32
  }
  func.func @transform_1(%arg0: i32, %arg1: i32) -> (i32, i32, i32) {
    %c0_i32 = arith.constant 0 : i32
    %c0_i32_0 = arith.constant 0 : i32
    %c0_i32_1 = arith.constant 0 : i32
    return %arg1, %c0_i32, %c0_i32_0 : i32, i32, i32
  }
  func.func @transform_2(%arg0: i32, %arg1: i32) -> (i32, i32, i32) {
    %c0_i32 = arith.constant 0 : i32
    %c0_i32_0 = arith.constant 0 : i32
    %c0_i32_1 = arith.constant 0 : i32
    return %arg1, %c0_i32, %c0_i32_0 : i32, i32, i32
  }
  func.func @transform_3(%arg0: i32, %arg1: i32) -> (i32, i32, i32) {
    %c0_i32 = arith.constant 0 : i32
    %c0_i32_0 = arith.constant 0 : i32
    %c0_i32_1 = arith.constant 0 : i32
    return %arg1, %c0_i32, %c0_i32_0 : i32, i32, i32
  }
  func.func @transform_4(%arg0: i32, %arg1: i32) -> (i32, i32, i32) {
    %c0_i32 = arith.constant 0 : i32
    %c0_i32_0 = arith.constant 0 : i32
    %c0_i32_1 = arith.constant 0 : i32
    return %arg1, %c0_i32, %c0_i32_0 : i32, i32, i32
  }
  func.func @transform_5(%arg0: i32, %arg1: i32) -> (i32, i32, i32) {
    %c0_i32 = arith.constant 0 : i32
    %c0_i32_0 = arith.constant 0 : i32
    %c0_i32_1 = arith.constant 0 : i32
    return %arg1, %c0_i32, %c0_i32_0 : i32, i32, i32
  }
  func.func @transform_6(%arg0: i32, %arg1: i32) -> (i32, i32, i32) {
    %c0_i32 = arith.constant 0 : i32
    %c0_i32_0 = arith.constant 0 : i32
    %c0_i32_1 = arith.constant 0 : i32
    return %arg1, %c0_i32, %c0_i32_0 : i32, i32, i32
  }
  func.func @transform_7(%arg0: i32, %arg1: i32) -> (i32, i32, i32) {
    %c0_i32 = arith.constant 0 : i32
    %c0_i32_0 = arith.constant 0 : i32
    %c0_i32_1 = arith.constant 0 : i32
    return %arg1, %c0_i32, %c0_i32_0 : i32, i32, i32
  }
  func.func @transform_8(%arg0: i32, %arg1: i32) -> (i32, i32) {
    %c0_i32 = arith.constant 0 : i32
    %c0_i32_0 = arith.constant 0 : i32
    %c0_i32_1 = arith.constant 0 : i32
    return %c0_i32, %c0_i32_0 : i32, i32
  }
  func.func @transform_9(%arg0: i32, %arg1: i32) -> (i32, i32) {
    %c0_i32 = arith.constant 0 : i32
    %c0_i32_0 = arith.constant 0 : i32
    %c0_i32_1 = arith.constant 0 : i32
    return %c0_i32, %c0_i32_0 : i32, i32
  }
  func.func @transform_10(%arg0: i32, %arg1: i32) -> (i32, i32) {
    %c0_i32 = arith.constant 0 : i32
    %c0_i32_0 = arith.constant 0 : i32
    %c0_i32_1 = arith.constant 0 : i32
    return %c0_i32, %c0_i32_0 : i32, i32
  }
  func.func @transform_11(%arg0: i32, %arg1: i32) -> (i32, i32) {
    %c0_i32 = arith.constant 0 : i32
    %c0_i32_0 = arith.constant 0 : i32
    %c0_i32_1 = arith.constant 0 : i32
    return %c0_i32, %c0_i32_0 : i32, i32
  }
  func.func @transform_12(%arg0: i32, %arg1: i32) -> (i32, i32) {
    %c0_i32 = arith.constant 0 : i32
    %c0_i32_0 = arith.constant 0 : i32
    %c0_i32_1 = arith.constant 0 : i32
    return %c0_i32, %c0_i32_0 : i32, i32
  }
  func.func @transform_13(%arg0: i32, %arg1: i32) -> (i32, i32) {
    %c0_i32 = arith.constant 0 : i32
    %c0_i32_0 = arith.constant 0 : i32
    %c0_i32_1 = arith.constant 0 : i32
    return %c0_i32, %c0_i32_0 : i32, i32
  }
  func.func @transform_14(%arg0: i32, %arg1: i32) -> (i32, i32) {
    %c0_i32 = arith.constant 0 : i32
    %c0_i32_0 = arith.constant 0 : i32
    %c0_i32_1 = arith.constant 0 : i32
    return %c0_i32, %c0_i32_0 : i32, i32
  }
  func.func @transform_15(%arg0: i32, %arg1: i32) -> (i32, i32) {
    %c0_i32 = arith.constant 0 : i32
    %c0_i32_0 = arith.constant 0 : i32
    %c0_i32_1 = arith.constant 0 : i32
    return %c0_i32, %c0_i32_0 : i32, i32
  }
  func.func @transform_16(%arg0: i32, %arg1: i32) -> (i32, i32) {
    %c0_i32 = arith.constant 0 : i32
    %c0_i32_0 = arith.constant 0 : i32
    %c0_i32_1 = arith.constant 0 : i32
    return %c0_i32, %c0_i32_0 : i32, i32
  }
  func.func @transform_17(%arg0: i32, %arg1: i32) -> (i32, i32, i32) {
    %c0_i32 = arith.constant 0 : i32
    %c0_i32_0 = arith.constant 0 : i32
    %c0_i32_1 = arith.constant 0 : i32
    return %arg0, %c0_i32, %c0_i32_0 : i32, i32, i32
  }
}

</mosaic_0001>

<bundles_post_ra>
// kernel: tpu_custom_call.1
= control target key start
LH: loop header
LB: loop body
LE: loop exit
PB: predicated region body
PF: predicated region fallthrough
CT: control target
= control target key end

     0   :  { %s2175_s0 = inlined_call_operand.vmem [shape: f32[2,8,32], index: 0, kind: input, shape index: {}]   ;;  %s2176_s1 = inlined_call_operand.vmem [shape: bf16[4,32,8], index: 1, kind: input, shape index: {}]   ;;  %s2177_s2 = inlined_call_operand.vmem [shape: f32[4,1,8], index: 2, kind: input, shape index: {}]   ;;  %s2178_s3 = inlined_call_operand.vmem [shape: bf16[4,32,8], index: 3, kind: input, shape index: {}]   ;;  %s2179_s4 = inlined_call_operand.vmem [shape: f32[4,1,8], index: 4, kind: input, shape index: {}]   ;;  %s2180_s5 = inlined_call_operand.vmem [shape: bf16[4,32,8], index: 5, kind: input, shape index: {}]   ;;  %s2181_s6 = inlined_call_operand.vmem [shape: f32[4,1,8], index: 6, kind: input, shape index: {}]   ;;  %s2182_s7 = inlined_call_operand.vmem [shape: bf16[4,8,32], index: 7, kind: input, shape index: {}]   ;;  %s2183_s8 = inlined_call_operand.vmem [shape: f32[1,32], index: 8, kind: input, shape index: {}]   ;;  %s2184_s9 = inlined_call_operand.vmem [shape: bf16[32,64], index: 9, kind: input, shape index: {}]   ;;  %s2185_s10 = inlined_call_operand.vmem [shape: f32[1,64], index: 10, kind: input, shape index: {}]   ;;  %s2186_s11 = inlined_call_operand.vmem [shape: bf16[64,32], index: 11, kind: input, shape index: {}]   ;;  %s2187_s12 = inlined_call_operand.vmem [shape: f32[1,32], index: 12, kind: input, shape index: {}]   ;;  %s2188_s13 = inlined_call_operand.vmem [shape: f32[1,32], index: 13, kind: input, shape index: {}]   ;;  %s2189_s14 = inlined_call_operand.vmem [shape: f32[1,32], index: 14, kind: input, shape index: {}]   ;;  %s2190_s15 = inlined_call_operand.vmem [shape: f32[1,32], index: 15, kind: input, shape index: {}]   ;;  %s2191_s16 = inlined_call_operand.vmem [shape: f32[1,32], index: 16, kind: input, shape index: {}]   ;;  %s2192_s17 = inlined_call_operand.hbm [shape: f32[2,8,32], index: 17, kind: output, shape index: {}]  }
   0x1   :  { %2198 = sst [smem:[#allocation10_spill]] %s2175_s0 }
   0x2   :  { %2199 = sst [smem:[#allocation11_spill]] %s2176_s1 }
   0x3   :  { %2200 = sst [smem:[#allocation12_spill]] %s2185_s10 }
   0x4   :  { %2201 = sst [smem:[#allocation13_spill]] %s2187_s12 }
   0x5   :  { %2202 = sst [smem:[#allocation14_spill]] %s2191_s16 }
   0x6   :  { %2203 = sst [smem:[#allocation15_spill]] %s2192_s17 }
   0x7   :  { %22 = vsyncpa [#allocation5], 0  ;;  %s1934_s24 = smov 0   ;;  %s1936_s25 = smov 0  }
   0x8   :  { %s1938_s26 = smov 0  }
   0x9 LB: > { %2204 = sst [smem:[#allocation7_spill]] %s1830_s25  ;;  %s37_s28 = sadd.s32 1, %s1830_s25  ;;  %s1834_s26 = sphi %s1938_s26, %s28_s26   ;;  %s1830_s25 = sphi %s1936_s25, %s2220_s25   ;;  %s1826_s24 = sphi %s1934_s24, %s2219_s24  }
   0xa   : > { %2205 = sst [smem:[#allocation8_spill]] %s1834_s26  ;;  %p38_p0 = scmp.ge.s32.totalorder %s37_s28, 4 }
   0xb   : > { %p1566_p1 = scmp.ge.s32.totalorder %s1834_s26, 1  ;;  %p564_p2 = scmp.lt.s32.totalorder %s1834_s26, 5 }
   0xc   : > { %s2222_s28 = smov (%p38_p0, %s37_s28), 0 }
   0xd   : > { %2206 = sst [smem:[#allocation9_spill]] %s2222_s28  ;;  %p565_p3 = pnand %p1566_p1, %p564_p2 }
   0xe   : > { %p645_p4 = scmp.lt.s32.totalorder (!%p565_p3), %s1826_s24, 3  ;;  %s2207_s21 = sld [smem:[#allocation11_spill]] (!%p565_p3) }
   0xf   : > { %568 = sbr.rel (%p565_p3) target bundleno = 2349 (0x92d), region = 88  ;;  %p1574_p5 = scmp.ne.s32.totalorder (!%p565_p3), %s1826_s24, 0 }
  0x16   : > { %s1957_s29 = scalar_select %p645_p4, %s1826_s24, 3 }
  0x17   : > { %678 = sbr.rel (%p1574_p5) target bundleno = 350 (0x15e), region = 92  ;;  %s2208_s23 = sld [smem:[#allocation10_spill]] (!%p1574_p5)  ;;  %vm683_vm0 = vcmask (!%p1574_p5), 261120   ;;  %v1836_v3 = vmov (!%p1574_p5), 0.0   ;;  %v1575_v23 = vld [vmem:[%s2188_s13] ss:$0 sm:$0xff] (!%p1574_p5) }
  0x18   : > { %s1612_s0 = sshll.u32 %s1957_s29, 4  ;;  %s660_s26 = scalar_lea.vmem %s2179_s4, %s1957_s29  ;;  %729 = vst.msk [vmem:[#allocation3] sm:$0xff] (!%p1574_p5), %vm683_vm0, %v1836_v3  ;;  %730 = vst.msk [vmem:[#allocation3 + $0x8] sm:$0xff] (!%p1574_p5), %vm683_vm0, %v1836_v3  ;;  %v1576_v27 = vld [vmem:[%s2189_s14] ss:$0 sm:$0xff] (!%p1574_p5) }
  0x19   : > { %s1967_s22 = scalar_lea.vmem %s2207_s21, %s1612_s0  ;;  %s1972_s28 = scalar_lea.vmem %s2178_s3, %s1612_s0 }
  0x1a   : > { %s1981_s16 = scalar_lea.vmem %s2180_s5, %s1612_s0  ;;  %s668_s1 = scalar_lea.vmem %s2181_s6, %s1957_s29 }
  0x1b   : > { %s1573_s20 = sshll.u32 %s1957_s29, 2 }
  0x1c   : > { %s1991_s27 = scalar_lea.vmem %s2182_s7, %s1573_s20 }
  0x1d   : > { %v679_v0 = vld [vmem:[%s2208_s23] sm:$0xff] (!%p1574_p5)  ;;  %v680_v1 = vld [vmem:[%s2208_s23 + $0x8] sm:$0xff] (!%p1574_p5) }
  0x1e   : > { %v684_v2 = vsel %vm683_vm0, %v679_v0, 0.0  ;;  %v687_v4 = vsel %vm683_vm0, %v680_v1, 0.0 }
  0x1f   : > { %685 = vadd.xlane.f32.xlu0 %v684_v2 }
  0x23   : > { %688 = vadd.xlane.f32.xlu0 %v687_v4 }
  0xac   : > { %v686_v5 = vpop.xlane.xlu0 %685 }
  0xad   : > { %v691_v6 = vmul.f32 0.03125, %v686_v5 }
  0xaf   : > { %v693_v7 = vsub.f32 %v679_v0, %v691_v6 }
  0xb0   : > { %v689_v8 = vpop.xlane.xlu0 %688 }
  0xb1   : > { %v692_v9 = vmul.f32 0.03125, %v689_v8  ;;  %v695_v10 = vmul.f32 %v693_v7, %v693_v7 }
  0xb3   : > { %v694_v11 = vsub.f32 %v680_v1, %v692_v9  ;;  %v697_v12 = vsel %vm683_vm0, %v695_v10, 0.0 }
  0xb4   : > { %698 = vadd.xlane.f32.xlu1 %v697_v12 }
  0xb5   : > { %v696_v13 = vmul.f32 %v694_v11, %v694_v11 }
  0xb7   : > { %v700_v14 = vsel %vm683_vm0, %v696_v13, 0.0 }
  0xb8   : > { %701 = vadd.xlane.f32.xlu1 %v700_v14 }
 0x141   : > { %v699_v15 = vpop.xlane.xlu1 %698 }
 0x142   : > { %v703_v16 = vmul.f32 0.03125, %v699_v15 }
 0x144   : > { %v705_v17 = vadd.f32 1e-05, %v703_v16 }
 0x145   : > { %v702_v18 = vpop.xlane.xlu1 %701 }
 0x146   : > { %1754 = vrsqrt.f32 %v705_v17  ;;  %v704_v19 = vmul.f32 0.03125, %v702_v18 }
 0x148   : > { %v706_v20 = vadd.f32 1e-05, %v704_v19 }
 0x14a   : > { %1756 = vrsqrt.f32 %v706_v20 }
 0x150   : > { %v1755_v21 = vpop.eup %1754 }
 0x151   : > { %v709_v22 = vmul.f32 %v1755_v21, %v693_v7 }
 0x153   : > { %v717_v25 = vmul.f32 %v1575_v23, %v709_v22 }
 0x154   : > { %v1757_v24 = vpop.eup %1756 }
 0x155   : > { %v710_v26 = vmul.f32 %v1757_v24, %v694_v11  ;;  %v725_v29 = vadd.f32 %v1576_v27, %v717_v25 }
 0x157   : > { %v718_v28 = vmul.f32 %v1575_v23, %v710_v26 }
 0x159   : > { %v726_v30 = vadd.f32 %v1576_v27, %v718_v28 }
 0x15b   : > { %v727_v31 = vpack.c.bf16 %v726_v30, %v725_v29 }
 0x15d   : > { %728 = vst.msk [vmem:[#allocation2] sm:$0xff] %vm683_vm0, %v727_v31 }
 0x15e PF: > { %v1758_v32 = vld [vmem:[%s1972_s28] sm:$0xff]   ;;  %v1837_v33 = vmov 0.0   ;;  %v1759_v34 = vld [vmem:[%s1972_s28 + $0x8] sm:$0xff]   ;;  %vm1838_vm1 = vmmov 0   ;;  %vm755_vm2 = vcmask 261120   ;;  %vm934_vm3 = vcmask 64512   ;;  %s2209_s21 = scalar_lea.vmem %s2177_s2, %s1957_s29 }
 0x15f   : > { %1650 = vmatprep.subr.bf16.mxu1 %v1837_v33  ;;  %1642 = vmatprep.subr.bf16.mxu0 %v1837_v33  ;;  %v1760_v35 = vld [vmem:[%s1967_s22] sm:$0xff]   ;;  %v1761_v36 = vld [vmem:[%s1967_s22 + $0x8] sm:$0xff]   ;;  %vm1054_vm4 = vcmask 1043456   ;;  %p1594_p6 = scmp.ne.s32.totalorder %s1826_s24, 3 }
 0x160   : > { %1651 = vmatpush3.bf16.msra.mxu1 %v1758_v32  ;;  %1654 = vmatprep.mubr.msk.bf16.mxu1 %vm1838_vm1, %v1837_v33  ;;  %v1762_v38 = vld [vmem:[%s1981_s16] sm:$0xff]   ;;  %v1763_v39 = vld [vmem:[%s1981_s16 + $0x8] sm:$0xff]   ;;  %vm1840_vm5 = vmmov (!%p1594_p6), 0   ;;  %s2211_s29 = sld [smem:[#allocation14_spill]] (!%p1594_p6)  ;;  %s2212_s24 = sld [smem:[#allocation12_spill]] (!%p1594_p6)  ;;  %vm1373_vm6 = vcmask (!%p1594_p6), 523264  }
 0x161   : > { %1652 = vmatprep.subr.bf16.mxu1 %v1837_v33  ;;  %1646 = vmatprep.mubr.msk.bf16.mxu0 %vm1838_vm1, %v1837_v33  ;;  %v1581_v40 = vld [vmem:[%s660_s26] ss:$0 sm:$0xff]  ;;  %s2213_s30 = sld [smem:[#allocation13_spill]] (!%p1594_p6) }
 0x162   : > { %1643 = vmatpush3.bf16.msra.mxu0 %v1760_v35  ;;  %v1577_v45 = vld [vmem:[%s2209_s21] ss:$0 sm:$0xff] }
 0x163   : > { %1644 = vmatprep.subr.bf16.mxu0 %v1837_v33  ;;  %v1585_v57 = vld [vmem:[%s668_s1] ss:$0 sm:$0xff] }
 0x164   : > { %1653 = vmatpush3.bf16.msra.mxu1 %v1759_v34  ;;  %v731_v37 = vld [vmem:[#allocation2] sm:$0xff] }
 0x165   : > { %1666 = vmatprep.subr.bf16.mxu1 %v1837_v33 }
 0x166   : > { %1645 = vmatpush3.bf16.msra.mxu0 %v1761_v36  ;;  %v1147_v36 = vld [vmem:[%s1991_s27] sm:$0xf]  ;;  %s2210_s27 = sld [smem:[#allocation10_spill]] (!%p1594_p6) }
 0x167   : > { %1655 = vmatmul.mubr.msk.bf16.vlgmr.msra.gmra.mrb[0].mxu1 %vm755_vm2, %v731_v37  ;;  %1658 = vmatprep.subr.bf16.mxu0 %v1837_v33 }
 0x168   : > { %1668 = vmatprep.mubr.msk.bf16.mxu1 %vm1838_vm1, %v1837_v33 }
 0x169   : > { %1647 = vmatmul.mubr.msk.bf16.vlgmr.msra.gmra.mrb[0].mxu0 %vm755_vm2, %v731_v37 }
 0x16a   : > { %1659 = vmatpush3.bf16.msra.mxu0 %v1762_v38  ;;  %1662 = vmatprep.mubr.msk.bf16.mxu0 %vm1838_vm1, %v1837_v33 }
 0x16b   : > { %1660 = vmatprep.subr.bf16.mxu0 %v1837_v33 }
 0x16e   : > { %1661 = vmatpush3.bf16.msra.mxu0 %v1763_v39 }
 0x16f   : > { %1672 = vmatprep.subr.bf16.mxu0 %v1837_v33 }
 0x171   : > { %1663 = vmatmul.mubr.msk.bf16.vlgmr.msra.gmra.mrb[4].mxu0 %vm755_vm2, %v731_v37  ;;  %v1152_v37 = vsel %vm1054_vm4, %v1147_v36, 0  ;;  %v1598_v36 = vld [vmem:[%s2212_s24] ss:$0 sm:$0xff] (!%p1594_p6) }
 0x172   : > { %1674 = vmatprep.mubr.msk.bf16.mxu0 %vm1838_vm1, %v1837_v33 }
 0x23a   : > { %v857_v41 = vpop.f32.mrb[0].mxu1 }
 0x23b   : > { %v858_v42 = vadd.f32 %v1581_v40, %v857_v41  ;;  %v1656_v43 = vpop.f32.mrb[1].mxu1 }
 0x23c   : > { %v860_v44 = vpop.f32.mrb[2].mxu1  ;;  %v793_v46 = vpop.f32.mrb[0].mxu0 }
 0x23d   : > { %v930_v47 = vpack.c.bf16 %v858_v42, %v858_v42  ;;  %v861_v48 = vadd.f32 %v1581_v40, %v860_v44  ;;  %v1657_v49 = vpop.f32.mrb[3].mxu1  ;;  %v1648_v50 = vpop.f32.mrb[1].mxu0  ;;  %v794_v54 = vadd.f32 %v1577_v45, %v793_v46 }
 0x23e   : > { %v796_v51 = vpop.f32.mrb[2].mxu0 }
 0x23f   : > { %v939_v52 = vsel %vm934_vm3, %v930_v47, 0  ;;  %v931_v53 = vpack.c.bf16 %v861_v48, %v861_v48  ;;  %v1649_v55 = vpop.f32.mrb[3].mxu0  ;;  %v928_v58 = vpack.c.bf16 %v794_v54, %v794_v54  ;;  %v797_v59 = vadd.f32 %v1577_v45, %v796_v51  ;;  %v1144_v47 = vld [vmem:[#allocation3] sm:$0xff]  ;;  %v1145_v48 = vld [vmem:[#allocation3 + $0x8] sm:$0xff]  ;;  %v1203_v54 = vld [vmem:[%s2210_s27] sm:$0xff] (!%p1594_p6) }
 0x240   : > { %1667 = vmatpush3.bf16.xpose.msra.mxu1 %v939_v52 }
 0x241   : > { %v985_v56 = vsel %vm934_vm3, %v931_v53, 0  ;;  %1678 = vmatprep.subr.bf16.mxu1 %v1837_v33  ;;  %v929_v0 = vpack.c.bf16 %v797_v59, %v797_v59 }
 0x242   : > { %1673 = vmatpush3.bf16.xpose.msra.mxu0 %v985_v56  ;;  %v1595_v56 = vld [vmem:[%s2183_s8] ss:$0 sm:$0xff] (!%p1594_p6) }
 0x243   : > { %1684 = vmatprep.subr.bf16.mxu0 %v1837_v33 }
 0x244   : > { %v921_v60 = vpop.f32.mrb[4].mxu0 }
 0x245   : > { %v922_v61 = vadd.f32 %v1585_v57, %v921_v60  ;;  %v1664_v62 = vpop.f32.mrb[5].mxu0 }
 0x246   : > { %v924_v63 = vpop.f32.mrb[6].mxu0 }
 0x247   : > { %1669 = vmatmul.mubr.msk.bf16.vlgmr.msra.gmra.mrb[4].mxu1 %vm934_vm3, %v928_v58  ;;  %v932_v1 = vpack.c.bf16 %v922_v61, %v922_v61  ;;  %v925_v2 = vadd.f32 %v1585_v57, %v924_v63  ;;  %v1665_v3 = vpop.f32.mrb[7].mxu0  ;;  %v1204_v58 = vld [vmem:[%s2210_s27 + $0x8] sm:$0xff] (!%p1594_p6) }
 0x248   : > { %1680 = vmatprep.mubr.msk.bf16.mxu1 %vm1838_vm1, %v1837_v33 }
 0x249   : > { %1675 = vmatmul.mubr.msk.bf16.vlgmr.msra.gmra.mrb[8].mxu0 %vm934_vm3, %v929_v0  ;;  %v1056_v4 = vsel %vm1054_vm4, %v932_v1, 0  ;;  %v933_v5 = vpack.c.bf16 %v925_v2, %v925_v2 }
 0x24a   : > { %1679 = vmatpush3.bf16.msra.mxu1 %v1056_v4  ;;  %1686 = vmatprep.mubr.msk.bf16.mxu0 %vm1838_vm1, %v1837_v33 }
 0x24b   : > { %v1102_v6 = vsel %vm1054_vm4, %v933_v5, 0  ;;  %1690 = vmatprep.subr.bf16.mxu1 %v1837_v33 }
 0x24c   : > { %1685 = vmatpush3.bf16.msra.mxu0 %v1102_v6 }
 0x31a   : > { %v975_v7 = vpop.f32.mrb[4].mxu1 }
 0x31b   : > { %v1670_v8 = vpop.f32.mrb[5].mxu1  ;;  %v1027_v9 = vsel %vm934_vm3, %v975_v7, -inf }
 0x31c   : > { %1028 = vmax.xlane.f32.xlu0 %v1027_v9  ;;  %v978_v10 = vpop.f32.mrb[6].mxu1  ;;  %v1021_v11 = vpop.f32.mrb[8].mxu0 }
 0x31d   : > { %v1671_v12 = vpop.f32.mrb[7].mxu1  ;;  %v1676_v13 = vpop.f32.mrb[9].mxu0  ;;  %v1030_v16 = vsel %vm934_vm3, %v1021_v11, -inf }
 0x31e   : > { %v1024_v14 = vpop.f32.mrb[10].mxu0  ;;  %v1839_v12 = vmov (!%p1594_p6), 0.0   ;;  %v1773_v13 = vld [vmem:[%s2184_s9 + $0x8] sm:$0xff] (!%p1594_p6)  }
 0x31f   : > { %v1677_v15 = vpop.f32.mrb[11].mxu0  ;;  %1696 = vmatprep.subr.bf16.mxu0 (!%p1594_p6), %v1839_v12  ;;  %v1774_v14 = vld [vmem:[%s2186_s11] sm:$0xff] (!%p1594_p6)  }
 0x320   : > { %1031 = vmax.xlane.f32.xlu0 %v1030_v16  ;;  %v1775_v15 = vld [vmem:[%s2186_s11 + $0x8] sm:$0xff] (!%p1594_p6)  }
 0x3a9   : > { %v1029_v17 = vpop.xlane.xlu0 %1028 }
 0x3aa   : > { %v1033_v18 = vsub.f32 %v975_v7, %v1029_v17 }
 0x3ac   : > { %v1035_v19 = vmul.f32 1.442695, %v1033_v18 }
 0x3ad   : > { %v1032_v20 = vpop.xlane.xlu0 %1031 }
 0x3ae   : > { %1764 = vpow2.f32 %v1035_v19  ;;  %v1034_v21 = vsub.f32 %v1021_v11, %v1032_v20  ;;  %v1772_v11 = vld [vmem:[%s2184_s9] sm:$0xff] (!%p1594_p6)  }
 0x3b0   : > { %v1037_v22 = vmul.f32 1.442695, %v1034_v21 }
 0x3b2   : > { %1766 = vpow2.f32 %v1037_v22 }
 0x3b8   : > { %v1765_v23 = vpop.eup %1764 }
 0x3b9   : > { %v1039_v24 = vsel %vm934_vm3, %v1765_v23, 0.0 }
 0x3ba   : > { %1040 = vadd.xlane.f32.xlu1 %v1039_v24  ;;  %v1596_v24 = vld [vmem:[%s2190_s15] ss:$0 sm:$0xff] (!%p1594_p6) }
 0x3bc   : > { %v1767_v25 = vpop.eup %1766 }
 0x3bd   : > { %v1042_v26 = vsel %vm934_vm3, %v1767_v25, 0.0 }
 0x3be   : > { %1043 = vadd.xlane.f32.xlu1 %v1042_v26 }
 0x447   : > { %v1041_v27 = vpop.xlane.xlu1 %1040 }
 0x448   : > { %1768 = vrcp.f32 %v1041_v27 }
 0x44b   : > { %v1044_v28 = vpop.xlane.xlu1 %1043 }
 0x44c   : > { %1770 = vrcp.f32 %v1044_v28  ;;  %v1597_v28 = vld [vmem:[%s2211_s29] ss:$0 sm:$0xff] (!%p1594_p6) }
 0x452   : > { %v1769_v29 = vpop.eup %1768 }
 0x453   : > { %v1047_v30 = vmul.f32 %v1769_v29, %v1765_v23 }
 0x455   : > { %v1049_v31 = vpack.c.bf16 %v1047_v30, %v1047_v30 }
 0x456   : > { %v1771_v32 = vpop.eup %1770 }
 0x457   : > { %v1048_v34 = vmul.f32 %v1771_v32, %v1767_v25  ;;  %1681 = vmatmul.mubr.msk.bf16.vlgmr.msra.gmra.mrb[8].mxu1 %vm934_vm3, %v1049_v31 }
 0x458   : > { %1692 = vmatprep.mubr.msk.bf16.mxu1 %vm1838_vm1, %v1837_v33  ;;  %1691 = vmatpush3.bf16.msra.mxu1 %v1152_v37 }
 0x459   : > { %v1050_v35 = vpack.c.bf16 %v1048_v34, %v1048_v34  ;;  %1704 = vmatprep.subr.bf16.mxu1 (!%p1594_p6), %v1839_v12  ;;  %v1776_v34 = vld [vmem:[%s2186_s11 + $0x10] sm:$0xff] (!%p1594_p6)  }
 0x45b   : > { %1687 = vmatmul.mubr.msk.bf16.vlgmr.msra.gmra.mrb[12].mxu0 %vm934_vm3, %v1050_v35  ;;  %v1777_v35 = vld [vmem:[%s2186_s11 + $0x18] sm:$0xff] (!%p1594_p6)  }
 0x45c   : > { %1700 = vmatprep.mubr.msk.bf16.mxu0 (!%p1594_p6), %vm1840_vm5, %v1839_v12  ;;  %1697 = vmatpush3.bf16.msra.mxu0 (!%p1594_p6), %v1772_v11 }
 0x45d   : > { %1698 = vmatprep.subr.bf16.mxu0 (!%p1594_p6), %v1839_v12 }
 0x460   : > { %1699 = vmatpush3.bf16.msra.mxu0 (!%p1594_p6), %v1773_v13 }
 0x52a   : > { %v1092_v38 = vpop.f32.mrb[8].mxu1 }
 0x52b   : > { %v1682_v39 = vpop.f32.mrb[9].mxu1 }
 0x52c   : > { %v1095_v40 = vpop.f32.mrb[10].mxu1 }
 0x52d   : > { %v1683_v41 = vpop.f32.mrb[11].mxu1 }
 0x52e   : > { %v1138_v42 = vpop.f32.mrb[12].mxu0 }
 0x52f   : > { %v1146_v43 = vpack.c.bf16 %v1138_v42, %v1092_v38  ;;  %v1688_v44 = vpop.f32.mrb[13].mxu0 }
 0x530   : > { %v1141_v45 = vpop.f32.mrb[14].mxu0 }
 0x531   : > { %v1689_v46 = vpop.f32.mrb[15].mxu0  ;;  %1693 = vmatmul.mubr.msk.bf16.vlgmr.msra.gmra.mrb[12].mxu1 %vm934_vm3, %v1146_v43 }
 0x532   : > { %1712 = vmatprep.mubr.msk.bf16.mxu1 (!%p1594_p6), %vm1840_vm5, %v1839_v12  ;;  %1705 = vmatpush3.bf16.msra.mxu1 (!%p1594_p6), %v1774_v14  ;;  %v1602_v46 = vld [vmem:[%s2213_s30] ss:$0 sm:$0xff] (!%p1594_p6) }
 0x533   : > { %1706 = vmatprep.subr.bf16.mxu1 (!%p1594_p6), %v1839_v12 }
 0x536   : > { %1707 = vmatpush3.bf16.msra.mxu1 (!%p1594_p6), %v1775_v15 }
 0x537   : > { %1708 = vmatprep.subr.bf16.mxu1 (!%p1594_p6), %v1839_v12 }
 0x53a   : > { %1709 = vmatpush3.bf16.msra.mxu1 (!%p1594_p6), %v1776_v34 }
 0x53b   : > { %1710 = vmatprep.subr.bf16.mxu1 (!%p1594_p6), %v1839_v12 }
 0x53e   : > { %1711 = vmatpush3.bf16.msra.mxu1 (!%p1594_p6), %v1777_v35 }
 0x603   : > { %1202 = sbr.rel (%p1594_p6) target bundleno = 2313 (0x909), region = 96 }
 0x604   : > { %v1188_v33 = vpop.f32.mrb[12].mxu1 }
 0x605   : > { %v1195_v49 = vadd.f32 %v1188_v33, %v1144_v47  ;;  %v1694_v50 = vpop.f32.mrb[13].mxu1 }
 0x606   : > { %v1191_v51 = vpop.f32.mrb[14].mxu1 }
 0x607   : > { %1197 = vst.msk [vmem:[#allocation3] sm:$0xff] %vm755_vm2, %v1195_v49  ;;  %v1196_v52 = vadd.f32 %v1191_v51, %v1145_v48  ;;  %v1695_v53 = vpop.f32.mrb[15].mxu1 }
 0x609   : > { %1198 = vst.msk [vmem:[#allocation3 + $0x8] sm:$0xff] %vm755_vm2, %v1196_v52 }
 0x60e   : > { %v1205_v55 = vld [vmem:[#allocation3] sm:$0xff] }
 0x60f   : > { %v1207_v57 = vadd.f32 %v1205_v55, %v1203_v54 }
 0x610   : > { %v1206_v59 = vld [vmem:[#allocation3 + $0x8] sm:$0xff] }
 0x611   : > { %v1208_v60 = vadd.f32 %v1206_v59, %v1204_v58  ;;  %v2091_v61 = vadd.f32 %v1595_v56, %v1207_v57 }
 0x613   : > { %v2093_v62 = vadd.f32 %v1595_v56, %v1208_v60  ;;  %v1220_v63 = vsel %vm755_vm2, %v2091_v61, 0.0 }
 0x614   : > { %1221 = vadd.xlane.f32.xlu0 %v1220_v63 }
 0x615   : > { %v1223_v0 = vsel %vm755_vm2, %v2093_v62, 0.0 }
 0x618   : > { %1224 = vadd.xlane.f32.xlu0 %v1223_v0 }
 0x6a1   : > { %v1222_v1 = vpop.xlane.xlu0 %1221 }
 0x6a2   : > { %v1227_v2 = vmul.f32 0.03125, %v1222_v1 }
 0x6a4   : > { %v1229_v3 = vsub.f32 %v2091_v61, %v1227_v2 }
 0x6a5   : > { %v1225_v4 = vpop.xlane.xlu0 %1224 }
 0x6a6   : > { %v1228_v5 = vmul.f32 0.03125, %v1225_v4  ;;  %v1231_v6 = vmul.f32 %v1229_v3, %v1229_v3 }
 0x6a8   : > { %v1230_v7 = vsub.f32 %v2093_v62, %v1228_v5  ;;  %v1233_v8 = vsel %vm755_vm2, %v1231_v6, 0.0 }
 0x6a9   : > { %1234 = vadd.xlane.f32.xlu1 %v1233_v8 }
 0x6aa   : > { %v1232_v9 = vmul.f32 %v1230_v7, %v1230_v7 }
 0x6ac   : > { %v1236_v10 = vsel %vm755_vm2, %v1232_v9, 0.0 }
 0x6ad   : > { %1237 = vadd.xlane.f32.xlu1 %v1236_v10 }
 0x736   : > { %v1235_v16 = vpop.xlane.xlu1 %1234 }
 0x737   : > { %v1239_v17 = vmul.f32 0.03125, %v1235_v16 }
 0x739   : > { %v1241_v18 = vadd.f32 1e-05, %v1239_v17 }
 0x73a   : > { %v1238_v19 = vpop.xlane.xlu1 %1237 }
 0x73b   : > { %1778 = vrsqrt.f32 %v1241_v18  ;;  %v1240_v20 = vmul.f32 0.03125, %v1238_v19 }
 0x73d   : > { %v1242_v21 = vadd.f32 1e-05, %v1240_v20 }
 0x73f   : > { %1780 = vrsqrt.f32 %v1242_v21 }
 0x745   : > { %v1779_v22 = vpop.eup %1778 }
 0x746   : > { %v1245_v23 = vmul.f32 %v1779_v22, %v1229_v3 }
 0x748   : > { %v1253_v27 = vmul.f32 %v1596_v24, %v1245_v23 }
 0x749   : > { %v1781_v25 = vpop.eup %1780 }
 0x74a   : > { %v1246_v26 = vmul.f32 %v1781_v25, %v1230_v7  ;;  %v1261_v30 = vadd.f32 %v1597_v28, %v1253_v27 }
 0x74c   : > { %v1254_v29 = vmul.f32 %v1596_v24, %v1246_v26 }
 0x74e   : > { %v1262_v31 = vadd.f32 %v1597_v28, %v1254_v29 }
 0x750   : > { %v1263_v32 = vpack.c.bf16 %v1262_v31, %v1261_v30 }
 0x752   : > { %1701 = vmatmul.mubr.msk.bf16.vlgmr.msra.gmra.mrb[0].mxu0 %vm755_vm2, %v1263_v32 }
 0x825   : > { %v1324_v37 = vpop.f32.mrb[0].mxu0 }
 0x826   : > { %v1325_v38 = vadd.f32 %v1598_v36, %v1324_v37  ;;  %v1702_v39 = vpop.f32.mrb[1].mxu0 }
 0x827   : > { %v1327_v40 = vpop.f32.mrb[2].mxu0 }
 0x828   : > { %v1328_v41 = vadd.f32 %v1598_v36, %v1327_v40  ;;  %v1703_v42 = vpop.f32.mrb[3].mxu0  ;;  %v1331_v43 = vmax.f32 %v1325_v38, 0.0 }
 0x82a   : > { %v1332_v44 = vmax.f32 %v1328_v41, 0.0 }
 0x82c   : > { %v1333_v45 = vpack.c.bf16 %v1332_v44, %v1331_v43 }
 0x82e   : > { %1713 = vmatmul.mubr.msk.bf16.vlgmr.msra.gmra.mrb[0].mxu1 %vm1373_vm6, %v1333_v45 }
 0x901   : > { %v1411_v47 = vpop.f32.mrb[0].mxu1 }
 0x902   : > { %v1412_v33 = vadd.f32 %v1602_v46, %v1411_v47  ;;  %v1714_v48 = vpop.f32.mrb[1].mxu1 }
 0x903   : > { %v1414_v49 = vpop.f32.mrb[2].mxu1 }
 0x904   : > { %v1418_v50 = vadd.f32 %v1412_v33, %v2091_v61  ;;  %v1415_v51 = vadd.f32 %v1602_v46, %v1414_v49  ;;  %v1715_v52 = vpop.f32.mrb[3].mxu1 }
 0x906   : > { %1420 = vst.msk [vmem:[#allocation4] sm:$0xff] %vm755_vm2, %v1418_v50  ;;  %v1419_v53 = vadd.f32 %v1415_v51, %v2093_v62 }
 0x908   : > { %1421 = vst.msk [vmem:[#allocation4 + $0x8] sm:$0xff] %vm755_vm2, %v1419_v53 }
 0x909 PF: > { %s2214_s18 = sld [smem:[#allocation8_spill]]  ;;  %s1841_s16 = smov [#allocation4]  }
 0x90a   : > { %s1431_s20 = sshll.u32 %s1841_s16, 4  ;;  %s1432_s20 = int_to_ptr.vmem [resolvable:$true] %s1431_s20 }
 0x90b   : > { %s1782_s21 = scalar_lea.vmem %s1432_s20, 256  ;;  %p1789_p11 = scmp.lt.s32.totalorder %s1432_s20, %s1432_s20 }
 0x90c   : > { %p1783_p8 = scmp.ne.s32.totalorder %s1432_s20, %s1782_s21  ;;  %p1790_p12 = scmp.lt.s32.totalorder %s1782_s21, %s1782_s21 }
 0x90e   : > { %p1791_p13 = por %p1790_p12, %p1789_p11 }
 0x90f   : > { %s2215_s28 = sadd.s32 4294967295, %s2214_s18  }
 0x910   : > { %p2140_p7 = scmp.eq.s32.totalorder %s2215_s28, 3 }
 0x912   : > { %p1784_p9 = pnand %p1783_p8, %p2140_p7 }
 0x914   : > { %p1785_p10 = pneg %p1784_p9 }
 0x916   : > { %p1792_p0 = pnand %p1791_p13, %p1785_p10 }
 0x918   : > { %1795 = shalt.err (!%p1792_p0)
}
 0x919   : > { %s2217_s29 = sld [smem:[#allocation15_spill]] }
 0x91f   : > { %s1796_s1 = scalar_lea.hbm %s2217_s29, 256 }
 0x920   : > { %p1797_p1 = scmp.ne.s32.totalorder %s2217_s29, %s1796_s1  ;;  %p1802_p4 = scmp.lt.u32.totalorder %s1796_s1, %s2217_s29 }
 0x922   : > { %p1798_p2 = pnand %p1797_p1, %p2140_p7 }
 0x924   : > { %p1799_p3 = pneg %p1798_p2 }
 0x926   : > { %p1804_p5 = pnand %p1802_p4, %p1799_p3 }
 0x928   : > { %1807 = shalt.err (!%p1804_p5)
}
 0x929   : > { %s1842_s12 = smov 128   ;;  %s1843_s24 = smov 8  }
 0x92a   : > { %1717 = dma.vmem_to_hbm [thread:$0]  (%p2140_p7), %s1432_s20, 256, %s2217_s29, [#allocation5], %s1842_s12, %s1842_s12, %s1843_s24  }
 0x92b   : > { %1821 = dma.done.wait (%p2140_p7), [#allocation5], 256  }
 0x92c   : > { %1823 = vsyncadd (%p2140_p7), [#allocation5], 4294967040 }
 0x92d PF: > { %s2218_s30 = sld [smem:[#allocation8_spill]]  ;;  %s2219_s24 = sld [smem:[#allocation7_spill]] }
 0x92e   : > { %s2220_s25 = sld [smem:[#allocation9_spill]] }
 0x933   : > { %s28_s26 = sadd.s32 1, %s2218_s30  }
 0x934   : > { %p25_p6 = scmp.ge.s32.totalorder %s28_s26, 6  }
 0x936   :  { %27 = sbr.rel (!%p25_p6) target bundleno = 9 (0x9), region = 145 }
 0x93d   :  { %1447 = vsyncpa [#allocation5], 1 }
 0x93e   :  { %1449 = vsyncpa [#allocation5 + $0x1], 1 }

</bundles_post_ra>
